<compile_context>
chip_gen: v7x
topology: tpu7x:2x2x1
jax: 0.10.0
libtpu: 0.0.40
codegen_flags: <defaults>
</compile_context>

<pallas_src>
import functools

import jax
import jax.numpy as jnp
from jax import lax
from jax.experimental import pallas as pl
from jax.experimental.pallas import tpu as pltpu


# --------------------------------------------------------------------------
# Fused Pallas kernel: conv1 -> relu -> (dropout eval) -> conv2 -> pool -> MLP
# --------------------------------------------------------------------------
def _gat_fused_kernel(x_ref, adj_ref, pool_ref,
                      w1_ref, as1_ref, ad1_ref, b1_ref,
                      w2_ref, as2_ref, ad2_ref, b2_ref,
                      cw1_ref, cb1_ref, cw2_ref, cb2_ref,
                      node_ref, reps_ref, logits_ref,
                      *, negative_slope):
  # Additive attention mask from the shared adjacency (0 on edges, -1e30 on
  # non-edges).  Computed ONCE and reused by both GAT layers.
  adj = adj_ref[...]                                             # [N, N]
  neg_mask = jnp.where(adj > 0.0, 0.0, -1e30)                    # [N, N]

  def gat_layer(x, w, att_src, att_dst, bias):
    h = jnp.dot(x, w, preferred_element_type=jnp.float32)        # [N, C]
    # Destination logits as a column [N, 1]; source logits directly as a
    # lane-major row [1, N] by contracting the channel dim (no relayout).
    e_dst = lax.dot_general(h, att_dst, (((1,), (1,)), ((), ())),
                            preferred_element_type=jnp.float32)  # [N, 1]
    e_src = lax.dot_general(att_src, h, (((1,), (1,)), ((), ())),
                            preferred_element_type=jnp.float32)  # [1, N]
    e = e_dst + e_src                                            # [N, N]
    e = jnp.where(e > 0.0, e, negative_slope * e)                # leaky_relu
    e = e + neg_mask                                             # mask non-edges

    # Masked softmax over source nodes j.  Every row has its self-loop, so the
    # row max is finite and exp() of masked entries underflows to exactly 0;
    # no second adjacency select is needed.
    m = jnp.max(e, axis=-1, keepdims=True)
    p = jnp.exp(e - m)
    inv_denom = pl.reciprocal(jnp.sum(p, axis=-1, keepdims=True), approx=True)
    alpha = p * inv_denom                                        # [N, N]
    return jnp.dot(alpha, h, preferred_element_type=jnp.float32) + bias

  # conv1 -> relu -> dropout(p=0.5)
  h1 = gat_layer(x_ref[...], w1_ref[...], as1_ref[...], ad1_ref[...],
                 b1_ref[...])
  h1 = jnp.maximum(h1, 0.0)
  # TODO(synk): training-mode dropout RNG not implemented (eval: identity).

  # conv2 (no activation afterwards, matching the reference forward)
  h2 = gat_layer(h1, w2_ref[...], as2_ref[...], ad2_ref[...], b2_ref[...])

  # global_mean_pool: pool [B, N] holds 1/|graph_b| at member node columns.
  reps = jnp.dot(pool_ref[...], h2, preferred_element_type=jnp.float32)  # [B,H]

  # classifier MLP: Linear -> ReLU -> Linear
  hid = jnp.dot(reps, cw1_ref[...],
                preferred_element_type=jnp.float32) + cb1_ref[...]
  hid = jnp.maximum(hid, 0.0)
  logits = jnp.dot(hid, cw2_ref[...],
                   preferred_element_type=jnp.float32) + cb2_ref[...]

  node_ref[...] = h2
  reps_ref[...] = reps
  logits_ref[...] = logits


# --------------------------------------------------------------------------
# Wrapper: single pallas_call, full-array blocks (tiny graph fits in VMEM).
# TODO(synk): for large N, tile destination rows ("parallel") x source tiles
# ("arbitrary") with an online softmax and block-sparse adjacency skipping.
# --------------------------------------------------------------------------
def _full_spec(shape):
  return pl.BlockSpec(shape, lambda: (0,) * len(shape))


def gat_forward(params, x, adj, pool_mat, *, negative_slope=0.2):
  n = x.shape[0]
  hdim = params["w1"].shape[1]
  b = pool_mat.shape[0]
  o = params["cw2"].shape[1]

  operands = (x, adj, pool_mat,
              params["w1"], params["as1"], params["ad1"], params["b1"],
              params["w2"], params["as2"], params["ad2"], params["b2"],
              params["cw1"], params["cb1"], params["cw2"], params["cb2"])

  kernel = functools.partial(_gat_fused_kernel, negative_slope=negative_slope)
  return pl.pallas_call(
      kernel,
      out_shape=(jax.ShapeDtypeStruct((n, hdim), jnp.float32),
                 jax.ShapeDtypeStruct((b, hdim), jnp.float32),
                 jax.ShapeDtypeStruct((b, o), jnp.float32)),
      in_specs=[_full_spec(op.shape) for op in operands],
      out_specs=(_full_spec((n, hdim)), _full_spec((b, hdim)),
                 _full_spec((b, o))),
      compiler_params=pltpu.CompilerParams(vmem_limit_bytes=32 * 1024 * 1024),
  )(*operands)


# --------------------------------------------------------------------------
# Deterministic parameter / input construction
# --------------------------------------------------------------------------
def _glorot(key, shape):
  fan_in, fan_out = shape[-2], shape[-1]
  limit = (6.0 / (fan_in + fan_out)) ** 0.5
  return jax.random.uniform(key, shape, jnp.float32, -limit, limit)


def build_params(key, num_features, hidden, out):
  ks = jax.random.split(key, 10)
  return {
      # GATConv 1
      "w1": _glorot(ks[0], (num_features, hidden)),
      "as1": _glorot(ks[1], (1, hidden)),
      "ad1": _glorot(ks[2], (1, hidden)),
      "b1": jnp.zeros((1, hidden), jnp.float32),
      # GATConv 2
      "w2": _glorot(ks[3], (hidden, hidden)),
      "as2": _glorot(ks[4], (1, hidden)),
      "ad2": _glorot(ks[5], (1, hidden)),
      "b2": jnp.zeros((1, hidden), jnp.float32),
      # classifier MLP
      "cw1": _glorot(ks[6], (hidden, hidden)),
      "cb1": jnp.zeros((1, hidden), jnp.float32),
      "cw2": _glorot(ks[7], (hidden, out)),
      "cb2": jnp.zeros((1, out), jnp.float32),
  }


def build_graph(num_nodes, nodes_per_graph):
  """Deterministic bidirectional ring per graph; returns dense adj + pool."""
  src, dst = [], []
  for g0 in range(0, num_nodes, nodes_per_graph):
    for i in range(nodes_per_graph):
      a = g0 + i
      b = g0 + (i + 1) % nodes_per_graph
      src += [a, b]
      dst += [b, a]
  edge_index = jnp.array([src, dst], dtype=jnp.int32)           # [2, E]
  batch = jnp.array([i // nodes_per_graph for i in range(num_nodes)],
                    dtype=jnp.int32)                             # [N]

  # dense adjacency adj[dst, src] (glue) + self-loops (add_self_loops=True)
  adj = jnp.zeros((num_nodes, num_nodes), jnp.float32)
  adj = adj.at[edge_index[1], edge_index[0]].set(1.0)
  adj = adj.at[jnp.arange(num_nodes), jnp.arange(num_nodes)].set(1.0)

  # mean-pool matrix [B, N]
  num_graphs = num_nodes // nodes_per_graph
  pool = (jnp.zeros((num_graphs, num_nodes), jnp.float32)
          .at[batch, jnp.arange(num_nodes)].set(1.0 / nodes_per_graph))
  return edge_index, batch, adj, pool


# --------------------------------------------------------------------------
if __name__ == "__main__":
  NUM_NODES = 16          # 2 graphs x 8 nodes
  NODES_PER_GRAPH = 8
  NUM_FEATURES = 8
  HIDDEN = 32
  OUT = 4

  key = jax.random.PRNGKey(0)
  k_x, k_p = jax.random.split(key)

  x = jax.random.normal(k_x, (NUM_NODES, NUM_FEATURES), jnp.float32)
  edge_index, batch, adj, pool_mat = build_graph(NUM_NODES, NODES_PER_GRAPH)
  params = build_params(k_p, NUM_FEATURES, HIDDEN, OUT)

  node_emb, graph_reps, logits = gat_forward(params, x, adj, pool_mat)
  jax.block_until_ready((node_emb, graph_reps, logits))

  assert node_emb.shape == (NUM_NODES, HIDDEN)
  assert graph_reps.shape == (NUM_NODES // NODES_PER_GRAPH, HIDDEN)
  assert logits.shape == (NUM_NODES // NODES_PER_GRAPH, OUT)
  assert bool(jnp.all(jnp.isfinite(node_emb)))
  assert bool(jnp.all(jnp.isfinite(graph_reps)))
  assert bool(jnp.all(jnp.isfinite(logits)))
  print("KERNEL_OK")
</pallas_src>

<mosaic_0001>
module attributes {stable_mosaic.version = 11 : i64} {
  func.func @_gat_fused_kernel(%arg0: memref<16x8xf32, #tpu.memory_space<vmem>>, %arg1: memref<16x16xf32, #tpu.memory_space<vmem>>, %arg2: memref<2x16xf32, #tpu.memory_space<vmem>>, %arg3: memref<8x32xf32, #tpu.memory_space<vmem>>, %arg4: memref<1x32xf32, #tpu.memory_space<vmem>>, %arg5: memref<1x32xf32, #tpu.memory_space<vmem>>, %arg6: memref<1x32xf32, #tpu.memory_space<vmem>>, %arg7: memref<32x32xf32, #tpu.memory_space<vmem>>, %arg8: memref<1x32xf32, #tpu.memory_space<vmem>>, %arg9: memref<1x32xf32, #tpu.memory_space<vmem>>, %arg10: memref<1x32xf32, #tpu.memory_space<vmem>>, %arg11: memref<32x32xf32, #tpu.memory_space<vmem>>, %arg12: memref<1x32xf32, #tpu.memory_space<vmem>>, %arg13: memref<32x4xf32, #tpu.memory_space<vmem>>, %arg14: memref<1x4xf32, #tpu.memory_space<vmem>>, %arg15: memref<16x32xf32, #tpu.memory_space<vmem>>, %arg16: memref<2x32xf32, #tpu.memory_space<vmem>>, %arg17: memref<2x4xf32, #tpu.memory_space<vmem>>) attributes {dimension_semantics = [], scalar_prefetch = 0 : i64, scratch_operands = 0 : i64, tpu.core_type = #tpu.core_type<tc>} {
    %c0 = arith.constant 0 : index
    %c0_0 = arith.constant 0 : index
    %0 = vector.load %arg1[%c0, %c0_0] : memref<16x16xf32, #tpu.memory_space<vmem>>, vector<16x16xf32>
    %cst = arith.constant 0.000000e+00 : f32
    %1 = vector.broadcast %cst : f32 to vector<16x16xf32>
    %2 = arith.cmpf ogt, %0, %1 : vector<16x16xf32>
    %cst_1 = arith.constant 0.000000e+00 : f32
    %cst_2 = arith.constant -1.000000e+30 : f32
    %3 = vector.broadcast %cst_1 : f32 to vector<16x16xf32>
    %4 = vector.broadcast %cst_2 : f32 to vector<16x16xf32>
    %5 = arith.select %2, %3, %4 : vector<16x16xi1>, vector<16x16xf32>
    %c0_3 = arith.constant 0 : index
    %c0_4 = arith.constant 0 : index
    %6 = vector.load %arg0[%c0_3, %c0_4] : memref<16x8xf32, #tpu.memory_space<vmem>>, vector<16x8xf32>
    %c0_5 = arith.constant 0 : index
    %c0_6 = arith.constant 0 : index
    %7 = vector.load %arg3[%c0_5, %c0_6] : memref<8x32xf32, #tpu.memory_space<vmem>>, vector<8x32xf32>
    %c0_7 = arith.constant 0 : index
    %c0_8 = arith.constant 0 : index
    %8 = vector.load %arg4[%c0_7, %c0_8] : memref<1x32xf32, #tpu.memory_space<vmem>>, vector<1x32xf32>
    %c0_9 = arith.constant 0 : index
    %c0_10 = arith.constant 0 : index
    %9 = vector.load %arg5[%c0_9, %c0_10] : memref<1x32xf32, #tpu.memory_space<vmem>>, vector<1x32xf32>
    %c0_11 = arith.constant 0 : index
    %c0_12 = arith.constant 0 : index
    %10 = vector.load %arg6[%c0_11, %c0_12] : memref<1x32xf32, #tpu.memory_space<vmem>>, vector<1x32xf32>
    %cst_13 = arith.constant dense<0.000000e+00> : vector<16x32xf32>
    %11 = tpu.matmul %6, %7, %cst_13 {dimension_numbers = #tpu.dot_dimension_numbers<[1], [0], [0], [1], [0, 0, 1, 1], [], []>} : vector<16x8xf32>, vector<8x32xf32>, vector<16x32xf32> -> vector<16x32xf32>
    %cst_14 = arith.constant dense<0.000000e+00> : vector<16x1xf32>
    %12 = tpu.matmul %11, %9, %cst_14 {dimension_numbers = #tpu.dot_dimension_numbers<[1], [1], [0], [0], [0, 0, 1, 0], [], []>} : vector<16x32xf32>, vector<1x32xf32>, vector<16x1xf32> -> vector<16x1xf32>
    %cst_15 = arith.constant dense<0.000000e+00> : vector<1x16xf32>
    %13 = tpu.matmul %8, %11, %cst_15 {dimension_numbers = #tpu.dot_dimension_numbers<[1], [1], [0], [0], [0, 0, 1, 0], [], []>} : vector<1x32xf32>, vector<16x32xf32>, vector<1x16xf32> -> vector<1x16xf32>
    %14 = vector.broadcast %12 : vector<16x1xf32> to vector<16x16xf32>
    %15 = vector.broadcast %13 : vector<1x16xf32> to vector<16x16xf32>
    %16 = arith.addf %14, %15 : vector<16x16xf32>
    %cst_16 = arith.constant 0.000000e+00 : f32
    %17 = vector.broadcast %cst_16 : f32 to vector<16x16xf32>
    %18 = arith.cmpf ogt, %16, %17 : vector<16x16xf32>
    %cst_17 = arith.constant 2.000000e-01 : f32
    %19 = vector.broadcast %cst_17 : f32 to vector<16x16xf32>
    %20 = arith.mulf %19, %16 : vector<16x16xf32>
    %21 = arith.select %18, %16, %20 : vector<16x16xi1>, vector<16x16xf32>
    %22 = arith.addf %21, %5 : vector<16x16xf32>
    %cst_18 = arith.constant dense<0xFF800000> : vector<16xf32>
    %23 = vector.multi_reduction <maximumf>, %22, %cst_18 [1] : vector<16x16xf32> to vector<16xf32>
    %24 = vector.shape_cast %23 : vector<16xf32> to vector<16x1xf32>
    %25 = vector.broadcast %24 : vector<16x1xf32> to vector<16x16xf32>
    %26 = arith.subf %22, %25 : vector<16x16xf32>
    %27 = math.exp %26 : vector<16x16xf32>
    %cst_19 = arith.constant dense<0.000000e+00> : vector<16xf32>
    %28 = vector.multi_reduction <add>, %27, %cst_19 [1] : vector<16x16xf32> to vector<16xf32>
    %29 = vector.shape_cast %28 : vector<16xf32> to vector<16x1xf32>
    %30 = tpu.reciprocal %29 {approx = true} : vector<16x1xf32> -> vector<16x1xf32>
    %31 = vector.broadcast %30 : vector<16x1xf32> to vector<16x16xf32>
    %32 = arith.mulf %27, %31 : vector<16x16xf32>
    %cst_20 = arith.constant dense<0.000000e+00> : vector<16x32xf32>
    %33 = tpu.matmul %32, %11, %cst_20 {dimension_numbers = #tpu.dot_dimension_numbers<[1], [0], [0], [1], [0, 0, 1, 1], [], []>} : vector<16x16xf32>, vector<16x32xf32>, vector<16x32xf32> -> vector<16x32xf32>
    %34 = vector.broadcast %10 : vector<1x32xf32> to vector<16x32xf32>
    %35 = arith.addf %33, %34 : vector<16x32xf32>
    %cst_21 = arith.constant 0.000000e+00 : f32
    %36 = vector.broadcast %cst_21 : f32 to vector<16x32xf32>
    %37 = arith.maximumf %35, %36 : vector<16x32xf32>
    %c0_22 = arith.constant 0 : index
    %c0_23 = arith.constant 0 : index
    %38 = vector.load %arg7[%c0_22, %c0_23] : memref<32x32xf32, #tpu.memory_space<vmem>>, vector<32x32xf32>
    %c0_24 = arith.constant 0 : index
    %c0_25 = arith.constant 0 : index
    %39 = vector.load %arg8[%c0_24, %c0_25] : memref<1x32xf32, #tpu.memory_space<vmem>>, vector<1x32xf32>
    %c0_26 = arith.constant 0 : index
    %c0_27 = arith.constant 0 : index
    %40 = vector.load %arg9[%c0_26, %c0_27] : memref<1x32xf32, #tpu.memory_space<vmem>>, vector<1x32xf32>
    %c0_28 = arith.constant 0 : index
    %c0_29 = arith.constant 0 : index
    %41 = vector.load %arg10[%c0_28, %c0_29] : memref<1x32xf32, #tpu.memory_space<vmem>>, vector<1x32xf32>
    %cst_30 = arith.constant dense<0.000000e+00> : vector<16x32xf32>
    %42 = tpu.matmul %37, %38, %cst_30 {dimension_numbers = #tpu.dot_dimension_numbers<[1], [0], [0], [1], [0, 0, 1, 1], [], []>} : vector<16x32xf32>, vector<32x32xf32>, vector<16x32xf32> -> vector<16x32xf32>
    %cst_31 = arith.constant dense<0.000000e+00> : vector<16x1xf32>
    %43 = tpu.matmul %42, %40, %cst_31 {dimension_numbers = #tpu.dot_dimension_numbers<[1], [1], [0], [0], [0, 0, 1, 0], [], []>} : vector<16x32xf32>, vector<1x32xf32>, vector<16x1xf32> -> vector<16x1xf32>
    %cst_32 = arith.constant dense<0.000000e+00> : vector<1x16xf32>
    %44 = tpu.matmul %39, %42, %cst_32 {dimension_numbers = #tpu.dot_dimension_numbers<[1], [1], [0], [0], [0, 0, 1, 0], [], []>} : vector<1x32xf32>, vector<16x32xf32>, vector<1x16xf32> -> vector<1x16xf32>
    %45 = vector.broadcast %43 : vector<16x1xf32> to vector<16x16xf32>
    %46 = vector.broadcast %44 : vector<1x16xf32> to vector<16x16xf32>
    %47 = arith.addf %45, %46 : vector<16x16xf32>
    %cst_33 = arith.constant 0.000000e+00 : f32
    %48 = vector.broadcast %cst_33 : f32 to vector<16x16xf32>
    %49 = arith.cmpf ogt, %47, %48 : vector<16x16xf32>
    %cst_34 = arith.constant 2.000000e-01 : f32
    %50 = vector.broadcast %cst_34 : f32 to vector<16x16xf32>
    %51 = arith.mulf %50, %47 : vector<16x16xf32>
    %52 = arith.select %49, %47, %51 : vector<16x16xi1>, vector<16x16xf32>
    %53 = arith.addf %52, %5 : vector<16x16xf32>
    %cst_35 = arith.constant dense<0xFF800000> : vector<16xf32>
    %54 = vector.multi_reduction <maximumf>, %53, %cst_35 [1] : vector<16x16xf32> to vector<16xf32>
    %55 = vector.shape_cast %54 : vector<16xf32> to vector<16x1xf32>
    %56 = vector.broadcast %55 : vector<16x1xf32> to vector<16x16xf32>
    %57 = arith.subf %53, %56 : vector<16x16xf32>
    %58 = math.exp %57 : vector<16x16xf32>
    %cst_36 = arith.constant dense<0.000000e+00> : vector<16xf32>
    %59 = vector.multi_reduction <add>, %58, %cst_36 [1] : vector<16x16xf32> to vector<16xf32>
    %60 = vector.shape_cast %59 : vector<16xf32> to vector<16x1xf32>
    %61 = tpu.reciprocal %60 {approx = true} : vector<16x1xf32> -> vector<16x1xf32>
    %62 = vector.broadcast %61 : vector<16x1xf32> to vector<16x16xf32>
    %63 = arith.mulf %58, %62 : vector<16x16xf32>
    %cst_37 = arith.constant dense<0.000000e+00> : vector<16x32xf32>
    %64 = tpu.matmul %63, %42, %cst_37 {dimension_numbers = #tpu.dot_dimension_numbers<[1], [0], [0], [1], [0, 0, 1, 1], [], []>} : vector<16x16xf32>, vector<16x32xf32>, vector<16x32xf32> -> vector<16x32xf32>
    %65 = vector.broadcast %41 : vector<1x32xf32> to vector<16x32xf32>
    %66 = arith.addf %64, %65 : vector<16x32xf32>
    %c0_38 = arith.constant 0 : index
    %c0_39 = arith.constant 0 : index
    %67 = vector.load %arg2[%c0_38, %c0_39] : memref<2x16xf32, #tpu.memory_space<vmem>>, vector<2x16xf32>
    %cst_40 = arith.constant dense<0.000000e+00> : vector<2x32xf32>
    %68 = tpu.matmul %67, %66, %cst_40 {dimension_numbers = #tpu.dot_dimension_numbers<[1], [0], [0], [1], [0, 0, 1, 1], [], []>} : vector<2x16xf32>, vector<16x32xf32>, vector<2x32xf32> -> vector<2x32xf32>
    %c0_41 = arith.constant 0 : index
    %c0_42 = arith.constant 0 : index
    %69 = vector.load %arg11[%c0_41, %c0_42] : memref<32x32xf32, #tpu.memory_space<vmem>>, vector<32x32xf32>
    %cst_43 = arith.constant dense<0.000000e+00> : vector<2x32xf32>
    %70 = tpu.matmul %68, %69, %cst_43 {dimension_numbers = #tpu.dot_dimension_numbers<[1], [0], [0], [1], [0, 0, 1, 1], [], []>} : vector<2x32xf32>, vector<32x32xf32>, vector<2x32xf32> -> vector<2x32xf32>
    %c0_44 = arith.constant 0 : index
    %c0_45 = arith.constant 0 : index
    %71 = vector.load %arg12[%c0_44, %c0_45] : memref<1x32xf32, #tpu.memory_space<vmem>>, vector<1x32xf32>
    %72 = vector.broadcast %71 : vector<1x32xf32> to vector<2x32xf32>
    %73 = arith.addf %70, %72 : vector<2x32xf32>
    %cst_46 = arith.constant 0.000000e+00 : f32
    %74 = vector.broadcast %cst_46 : f32 to vector<2x32xf32>
    %75 = arith.maximumf %73, %74 : vector<2x32xf32>
    %c0_47 = arith.constant 0 : index
    %c0_48 = arith.constant 0 : index
    %76 = vector.load %arg13[%c0_47, %c0_48] : memref<32x4xf32, #tpu.memory_space<vmem>>, vector<32x4xf32>
    %cst_49 = arith.constant dense<0.000000e+00> : vector<2x4xf32>
    %77 = tpu.matmul %75, %76, %cst_49 {dimension_numbers = #tpu.dot_dimension_numbers<[1], [0], [0], [1], [0, 0, 1, 1], [], []>} : vector<2x32xf32>, vector<32x4xf32>, vector<2x4xf32> -> vector<2x4xf32>
    %c0_50 = arith.constant 0 : index
    %c0_51 = arith.constant 0 : index
    %78 = vector.load %arg14[%c0_50, %c0_51] : memref<1x4xf32, #tpu.memory_space<vmem>>, vector<1x4xf32>
    %79 = vector.broadcast %78 : vector<1x4xf32> to vector<2x4xf32>
    %80 = arith.addf %77, %79 : vector<2x4xf32>
    %c0_52 = arith.constant 0 : index
    %c0_53 = arith.constant 0 : index
    %81 = vector.load %arg15[%c0_52, %c0_53] : memref<16x32xf32, #tpu.memory_space<vmem>>, vector<16x32xf32>
    tpu.vector_store %arg15[%c0_52, %c0_53], %66 {strides = array<i32>} : memref<16x32xf32, #tpu.memory_space<vmem>>, vector<16x32xf32>,
    %c0_54 = arith.constant 0 : index
    %c0_55 = arith.constant 0 : index
    %82 = vector.load %arg16[%c0_54, %c0_55] : memref<2x32xf32, #tpu.memory_space<vmem>>, vector<2x32xf32>
    tpu.vector_store %arg16[%c0_54, %c0_55], %68 {strides = array<i32>} : memref<2x32xf32, #tpu.memory_space<vmem>>, vector<2x32xf32>,
    %c0_56 = arith.constant 0 : index
    %c0_57 = arith.constant 0 : index
    %83 = vector.load %arg17[%c0_56, %c0_57] : memref<2x4xf32, #tpu.memory_space<vmem>>, vector<2x4xf32>
    tpu.vector_store %arg17[%c0_56, %c0_57], %80 {strides = array<i32>} : memref<2x4xf32, #tpu.memory_space<vmem>>, vector<2x4xf32>,
    return
  }
}

</mosaic_0001>

<bundles_post_ra>
// kernel: tpu_custom_call.1
= control target key start
LH: loop header
LB: loop body
LE: loop exit
PB: predicated region body
PF: predicated region fallthrough
CT: control target
= control target key end

     0   :  { %s1612_s0 = inlined_call_operand.vmem [shape: f32[16,8], index: 0, kind: input, shape index: {}]   ;;  %s1613_s1 = inlined_call_operand.hbm [shape: f32[16,16], index: 1, kind: input, shape index: {}]   ;;  %s1614_s2 = inlined_call_operand.vmem [shape: f32[2,16], index: 2, kind: input, shape index: {}]   ;;  %s1615_s3 = inlined_call_operand.hbm [shape: f32[8,32], index: 3, kind: input, shape index: {}]   ;;  %s1616_s4 = inlined_call_operand.vmem [shape: f32[1,32], index: 4, kind: input, shape index: {}]   ;;  %s1617_s5 = inlined_call_operand.vmem [shape: f32[1,32], index: 5, kind: input, shape index: {}]   ;;  %s1618_s6 = inlined_call_operand.vmem [shape: f32[1,32], index: 6, kind: input, shape index: {}]   ;;  %s1619_s7 = inlined_call_operand.vmem [shape: f32[32,32], index: 7, kind: input, shape index: {}]   ;;  %s1620_s8 = inlined_call_operand.vmem [shape: f32[1,32], index: 8, kind: input, shape index: {}]   ;;  %s1621_s9 = inlined_call_operand.vmem [shape: f32[1,32], index: 9, kind: input, shape index: {}]   ;;  %s1622_s10 = inlined_call_operand.vmem [shape: f32[1,32], index: 10, kind: input, shape index: {}]   ;;  %s1623_s11 = inlined_call_operand.vmem [shape: f32[32,32], index: 11, kind: input, shape index: {}]   ;;  %s1624_s12 = inlined_call_operand.vmem [shape: f32[1,32], index: 12, kind: input, shape index: {}]   ;;  %s1625_s13 = inlined_call_operand.vmem [shape: f32[32,4], index: 13, kind: input, shape index: {}]   ;;  %s1626_s14 = inlined_call_operand.vmem [shape: f32[1,4], index: 14, kind: input, shape index: {}]   ;;  %s1627_s15 = inlined_call_operand.hbm [shape: f32[16,32], index: 15, kind: output, shape index: {0}]   ;;  %s1628_s16 = inlined_call_operand.hbm [shape: f32[2,32], index: 16, kind: output, shape index: {1}]   ;;  %s1629_s17 = inlined_call_operand.hbm [shape: f32[2,4], index: 17, kind: output, shape index: {2}]  }
   0x1   :  { %1633 = sst [smem:[#allocation15_spill]] %s1612_s0 }
   0x2   :  { %1634 = sst [smem:[#allocation16_spill]] %s1613_s1 }
   0x3   :  { %1635 = sst [smem:[#allocation17_spill]] %s1629_s17 }
   0x4   :  { %23 = vsyncpa [#allocation3], 0 }
   0x5   :  { %24 = vsyncpa [#allocation6], 0 }
   0x6   :  { %25 = vsyncpa [#allocation4], 0 }
   0x7   :  { %26 = vsyncpa [#allocation9], 0  ;;  %s1309_s24 = smov [#allocation2]   ;;  %s1636_s28 = sld [smem:[#allocation16_spill]] }
   0x8   :  { %s34_s25 = sshll.u32 %s1309_s24, 4  ;;  %s35_s25 = int_to_ptr.vmem [resolvable:$true] %s34_s25 }
   0xd   :  { %s1191_s29 = scalar_lea.hbm %s1636_s28, 256 }
   0xe   :  { %p1192_p0 = scmp.ne.s32.totalorder %s1636_s28, %s1191_s29  ;;  %p1195_p1 = scmp.lt.u32.totalorder %s1191_s29, %s1636_s28 }
  0x10   :  { %p1197_p2 = pnand %p1195_p1, %p1192_p0 }
  0x12   :  { %1200 = shalt.err (!%p1197_p2)
}
  0x13   :  { %s1201_s1 = scalar_lea.vmem %s35_s25, 256  ;;  %p1206_p4 = scmp.lt.s32.totalorder %s35_s25, %s35_s25 }
  0x14   :  { %p1202_p3 = scmp.ne.s32.totalorder %s35_s25, %s1201_s1  ;;  %p1207_p5 = scmp.lt.s32.totalorder %s1201_s1, %s1201_s1 }
  0x16   :  { %p1208_p6 = por %p1207_p5, %p1206_p4 }
  0x18   :  { %p1209_p7 = pnand %p1208_p6, %p1202_p3 }
  0x1a   :  { %1212 = shalt.err (!%p1209_p7)
}
  0x1b   :  { %s1310_s20 = smov 128   ;;  %s1311_s21 = smov 8  }
  0x1c   :  { %40 = dma.hbm_to_vmem [thread:$0]  %s1636_s28, 256, %s35_s25, [#allocation3], %s1310_s20, %s1310_s20, %s1311_s21  }
  0x1d   :  { %s1312_s24 = smov [#allocation5]   ;;  %s1213_s0 = scalar_lea.hbm %s1615_s3, 128 }
  0x1e   :  { %s49_s26 = sshll.u32 %s1312_s24, 4  ;;  %p1214_p8 = scmp.ne.s32.totalorder %s1615_s3, %s1213_s0  ;;  %s50_s26 = int_to_ptr.vmem [resolvable:$true] %s49_s26 }
  0x1f   :  { %p1217_p9 = scmp.lt.u32.totalorder %s1213_s0, %s1615_s3 }
  0x21   :  { %p1219_p10 = pnand %p1217_p9, %p1214_p8 }
  0x23   :  { %1222 = shalt.err (!%p1219_p10)
}
  0x24   :  { %s1223_s17 = scalar_lea.vmem %s50_s26, 128  ;;  %p1228_p12 = scmp.lt.s32.totalorder %s50_s26, %s50_s26 }
  0x25   :  { %p1224_p11 = scmp.ne.s32.totalorder %s50_s26, %s1223_s17  ;;  %p1229_p13 = scmp.lt.s32.totalorder %s1223_s17, %s1223_s17 }
  0x27   :  { %p1230_p0 = por %p1229_p13, %p1228_p12 }
  0x29   :  { %p1231_p1 = pnand %p1230_p0, %p1224_p11 }
  0x2b   :  { %1234 = shalt.err (!%p1231_p1)
}
  0x2c   :  { %52 = dma.hbm_to_vmem [thread:$0]  %s1615_s3, 128, %s50_s26, [#allocation6]  }
  0x2d   :  { %1301 = dma.done.wait [#allocation3], 256  }
  0x2e   :  { %1302 = vsyncadd [#allocation3], 4294967040 }
  0x2f   :  { %1303 = dma.done.wait [#allocation6], 128  }
  0x30   :  { %1304 = vsyncadd [#allocation6], 4294967168  ;;  %vm93_vm0 = vcmask 64512   ;;  %v89_v0 = vld [vmem:[#allocation5] sm:$0xff]  ;;  %s1637_s24 = sld [smem:[#allocation15_spill]]  ;;  %v1313_v3 = vmov 0.0|0.0   ;;  %v269_v15 = vlaneseq }
  0x31   :  { %1052 = vmatprep.subr.mxu0 %v89_v0  ;;  %1125 = vmatprep.subr.bf16.mxu1 %v1313_v3  ;;  %vm1314_vm1 = vmmov 0   ;;  %v1315_v4 = vmov 0.0   ;;  %vm183_vm2 = vcmask 261120   ;;  %v995_v5 = vld [vmem:[%s1617_s5] ss:$0 sm:$0xff]  ;;  %v81_v19 = vld [vmem:[#allocation2] sm:$0xff] }
  0x32   :  { %1053 = vmatpush3.msra.mxu0 %v89_v0  ;;  %1061 = vmatprep.mubr.msk.f32.mxu1 %vm1314_vm1, %v1315_v4  ;;  %vm1451_vm3 = vmpackc.low %vm183_vm2, %vm183_vm2  ;;  %v90_v14 = vld [vmem:[%s1616_s4] sm:$0x1]  ;;  %v1466_v16 = vshrl.u32 %v269_v15, 7  ;;  %vm83_vm4 = vcmp.gt.f32.partialorder %v81_v19, 0.0  ;;  %v82_v23 = vld [vmem:[#allocation2 + $0x8] sm:$0xff]  ;;  %vm283_vm8 = vcmask 130048  }
  0x33   :  { %v1316_v27 = vmov -1e+30   ;;  %vm84_vm5 = vcmp.gt.f32.partialorder %v82_v23, 0.0  ;;  %v395_v48 = vld [vmem:[%s1619_s7] sm:$0xff]  ;;  %v396_v49 = vld [vmem:[%s1619_s7 + $0x8] sm:$0xff]  ;;  %v397_v57 = vld [vmem:[%s1619_s7 + $0x10] sm:$0xff] }
  0x34   :  { %v271_v18 = vsub.s32 0, %v1466_v16  ;;  %v1471_v28 = vsel %vm83_vm4, 0.0, %v1316_v27  ;;  %v1473_v32 = vsel %vm84_vm5, 0.0, %v1316_v27  ;;  %v1133_v50 = vpack.c.bf16 %v396_v49, %v395_v48  ;;  %v398_v58 = vld [vmem:[%s1619_s7 + $0x18] sm:$0xff]  ;;  %v999_v60 = vld [vmem:[%s1618_s6] ss:$0 sm:$0xff] }
  0x35   :  { %v1137_v59 = vpack.c.bf16 %v398_v58, %v397_v57  ;;  %v776_v49 = vld [vmem:[%s1623_s11 + $0x18] sm:$0xff]  ;;  %v699_v57 = vld [vmem:[%s1614_s2] sm:$0x3]  ;;  %vm944_vm11 = vcmask 254976   ;;  %s1317_s6 = smov [#allocation8]  }
  0x36   :  { %v87_v1 = vld [vmem:[%s1637_s24] sm:$0xff]  ;;  %v88_v2 = vld [vmem:[%s1637_s24 + $0x8] sm:$0xff]  ;;  %s966_s7 = sshll.u32 %s1317_s6, 4  ;;  %s967_s7 = int_to_ptr.vmem [resolvable:$true] %s966_s7 }
  0x37   :  { %1054 = vmatprep.mubr.msk.f32.mxu0 %vm93_vm0, %v87_v1  ;;  %v858_v58 = vld [vmem:[%s1625_s13] sm:$0xff]  ;;  %s1235_s29 = scalar_lea.vmem %s967_s7, 32  ;;  %p1240_p3 = scmp.lt.s32.totalorder %s967_s7, %s967_s7 }
  0x38   :  { %1055 = vmatmul.mubr.msk.f32.vlgmr.msra.gmra.mrb[0].mxu0 %vm93_vm0, %v88_v2  ;;  %p1236_p2 = scmp.ne.s32.totalorder %s967_s7, %s1235_s29  ;;  %p1241_p4 = scmp.lt.s32.totalorder %s1235_s29, %s1235_s29 }
  0x3a   :  { %p1242_p5 = por %p1241_p4, %p1240_p3 }
  0x3c   :  { %p1243_p6 = pnand %p1242_p5, %p1236_p2 }
 0x10b   :  { %v1056_v6 = vpop.f32.mrb[0].mxu0 }
 0x10c   :  { %v166_v7 = vpop.f32.mrb[1].mxu0  ;;  %v182_v11 = vmul.f32 %v1056_v6, %v995_v5 }
 0x10d   :  { %v1126_v9 = vpack.c.bf16 %v1056_v6, %v166_v7  ;;  %v181_v10 = vmul.f32 %v995_v5, %v166_v7  ;;  %v1004_v5 = vld [vmem:[%s1621_s9] ss:$0 sm:$0xff] }
 0x10e   :  { %v187_v13 = vsel %vm183_vm2, %v182_v11, 0.0 }
 0x10f   :  { %1128 = vmatpush3.bf16.xpose.msk.msra.mxu1 %vm1451_vm3, %v1126_v9  ;;  %1130 = vmatprep.subr.bf16.mxu0 %v1126_v9  ;;  %v184_v12 = vsel %vm183_vm2, %v181_v10, 0.0 }
 0x110   :  { %1132 = vmatpush3.bf16.msra.mxu0 %v1126_v9  ;;  %185 = vadd.xlane.f32.xlu0 %v184_v12 }
 0x111   :  { %1141 = vmatprep.subr.bf16.mxu1 %v1313_v3  ;;  %1134 = vmatprep.subr.bf16.mxu0 %v1133_v50 }
 0x114   :  { %188 = vadd.xlane.f32.xlu0 %v187_v13 }
 0x116   :  { %1062 = vmatmul.mubr.msk.f32.vlgmr.msra.gmra.mrb[0].mxu1 %vm183_vm2, %v90_v14  ;;  %v399_v14 = vld [vmem:[%s1620_s8] sm:$0x1]  ;;  %s1318_s8 = smov [#allocation7]  }
 0x117   :  { %1086 = vmatprep.mubr.msk.f32.mxu1 %vm1314_vm1, %v1315_v4  ;;  %s953_s9 = sshll.u32 %s1318_s8, 4  ;;  %s954_s9 = int_to_ptr.vmem [resolvable:$true] %s953_s9 }
 0x19d   :  { %v186_v17 = vpop.xlane.xlu0 %185 }
 0x1a1   :  { %v189_v24 = vpop.xlane.xlu0 %188 }
 0x1e9   :  { %v265_v20 = vpop.f32.mrb[0].mxu1 }
 0x1ea   :  { %v272_v21 = vrot.slane %v265_v20, %v271_v18  ;;  %v1063_v22 = vpop.f32.mrb[1].mxu1 }
 0x1ec   :  { %v273_v25 = vadd.f32 %v272_v21, %v186_v17  ;;  %v274_v26 = vadd.f32 %v272_v21, %v189_v24 }
 0x1ee   :  { %v277_v29 = vmul.f32 0.2, %v273_v25  ;;  %v278_v30 = vmul.f32 0.2, %v274_v26  ;;  %vm275_vm6 = vcmp.gt.f32.partialorder %v273_v25, 0.0  ;;  %vm276_vm7 = vcmp.gt.f32.partialorder %v274_v26, 0.0 }
 0x1f0   :  { %v279_v31 = vsel %vm275_vm6, %v273_v25, %v277_v29  ;;  %v280_v33 = vsel %vm276_vm7, %v274_v26, %v278_v30 }
 0x1f1   :  { %v281_v34 = vadd.f32 %v279_v31, %v1471_v28  ;;  %v282_v36 = vadd.f32 %v280_v33, %v1473_v32 }
 0x1f3   :  { %v284_v35 = vsel %vm283_vm8, %v281_v34, -inf  ;;  %v287_v37 = vsel %vm283_vm8, %v282_v36, -inf }
 0x1f4   :  { %285 = vmax.xlane.f32.xlu1 %v284_v35 }
 0x1f8   :  { %288 = vmax.xlane.f32.xlu1 %v287_v37 }
 0x281   :  { %v286_v38 = vpop.xlane.xlu1 %285 }
 0x282   :  { %v290_v39 = vsub.f32 %v281_v34, %v286_v38 }
 0x284   :  { %v292_v40 = vmul.f32 1.442695, %v290_v39 }
 0x285   :  { %v289_v41 = vpop.xlane.xlu1 %288 }
 0x286   :  { %1175 = vpow2.f32 %v292_v40  ;;  %v291_v42 = vsub.f32 %v282_v36, %v289_v41 }
 0x288   :  { %v294_v43 = vmul.f32 1.442695, %v291_v42 }
 0x28a   :  { %1177 = vpow2.f32 %v294_v43 }
 0x290   :  { %v1176_v44 = vpop.eup %1175 }
 0x291   :  { %v296_v45 = vsel %vm283_vm8, %v1176_v44, 0.0 }
 0x292   :  { %297 = vadd.xlane.f32.xlu0 %v296_v45  ;;  %v773_v45 = vld [vmem:[%s1623_s11] sm:$0xff] }
 0x294   :  { %v1178_v46 = vpop.eup %1177 }
 0x295   :  { %v299_v47 = vsel %vm283_vm8, %v1178_v46, 0.0 }
 0x296   :  { %300 = vadd.xlane.f32.xlu1 %v299_v47  ;;  %v775_v47 = vld [vmem:[%s1623_s11 + $0x10] sm:$0xff] }
 0x31f   :  { %v298_v51 = vpop.xlane.xlu0 %297 }
 0x320   :  { %1179 = vrcp.f32 %v298_v51  ;;  %v1008_v51 = vld [vmem:[%s1622_s10] ss:$0 sm:$0xff] }
 0x323   :  { %v301_v52 = vpop.xlane.xlu1 %300 }
 0x324   :  { %1181 = vrcp.f32 %v301_v52 }
 0x32a   :  { %v1180_v53 = vpop.eup %1179 }
 0x32b   :  { %v304_v54 = vmul.f32 %v1180_v53, %v1176_v44 }
 0x32d   :  { %1068 = vmatprep.mubr.msk.f32.mxu0 %vm283_vm8, %v304_v54 }
 0x32e   :  { %v1182_v55 = vpop.eup %1181 }
 0x32f   :  { %v305_v56 = vmul.f32 %v1182_v55, %v1178_v46  ;;  %v774_v46 = vld [vmem:[%s1623_s11 + $0x8] sm:$0xff] }
 0x330   :  { %v1153_v48 = vpack.c.bf16 %v774_v46, %v773_v45 }
 0x331   :  { %1069 = vmatmul.mubr.msk.f32.vlgmr.msra.gmra.mrb[2].mxu0 %vm283_vm8, %v305_v56 }
 0x332   :  { %1136 = vmatpush3.bf16.msra.mxu0 %v1133_v50  ;;  %v1156_v50 = vpack.c.bf16 %v776_v49, %v775_v47 }
 0x333   :  { %1138 = vmatprep.subr.bf16.mxu0 %v1137_v59 }
 0x336   :  { %1140 = vmatpush3.bf16.msra.mxu0 %v1137_v59  ;;  %v859_v59 = vld [vmem:[%s1625_s13 + $0x8] sm:$0xff] }
 0x404   :  { %v1070_v61 = vpop.f32.mrb[2].mxu0 }
 0x405   :  { %v390_v62 = vadd.f32 %v1070_v61, %v999_v60  ;;  %v384_v63 = vpop.f32.mrb[3].mxu0 }
 0x406   :  { %v385_v0 = vadd.f32 %v999_v60, %v384_v63  ;;  %v1159_v60 = vpack.c.bf16 %v859_v59, %v858_v58  ;;  %v861_v63 = vld [vmem:[%s1625_s13 + $0x18] sm:$0xff] }
 0x407   :  { %v394_v2 = vmax.f32 %v390_v62, 0.0 }
 0x408   :  { %v393_v1 = vmax.f32 %v385_v0, 0.0 }
 0x40a   :  { %1079 = vmatprep.mubr.msk.f32.mxu0 %vm183_vm2, %v393_v1 }
 0x40b   :  { %1080 = vmatmul.mubr.msk.f32.vlgmr.msra.gmra.mrb[4].mxu0 %vm183_vm2, %v394_v2 }
 0x4de   :  { %v1081_v6 = vpop.f32.mrb[4].mxu0 }
 0x4df   :  { %v490_v7 = vmul.f32 %v1081_v6, %v1004_v5  ;;  %v474_v9 = vpop.f32.mrb[5].mxu0 }
 0x4e0   :  { %v489_v10 = vmul.f32 %v1004_v5, %v474_v9  ;;  %v1142_v11 = vpack.c.bf16 %v1081_v6, %v474_v9 }
 0x4e1   :  { %v494_v12 = vsel %vm183_vm2, %v490_v7, 0.0 }
 0x4e2   :  { %495 = vadd.xlane.f32.xlu1 %v494_v12  ;;  %1144 = vmatpush3.bf16.xpose.msk.msra.mxu1 %vm1451_vm3, %v1142_v11  ;;  %v491_v13 = vsel %vm183_vm2, %v489_v10, 0.0 }
 0x4e3   :  { %1146 = vmatprep.subr.bf16.mxu0 %v1142_v11  ;;  %492 = vadd.xlane.f32.xlu0 %v491_v13 }
 0x4e4   :  { %1148 = vmatpush3.bf16.msra.mxu0 %v1142_v11  ;;  %1149 = vmatprep.subr.bf16.mxu1 %v1313_v3 }
 0x4e5   :  { %1152 = vmatprep.subr.bf16.mxu0 %v1313_v3 }
 0x4e9   :  { %1087 = vmatmul.mubr.msk.f32.vlgmr.msra.gmra.mrb[2].mxu1 %vm183_vm2, %v399_v14 }
 0x4ea   :  { %1100 = vmatprep.mubr.msk.f32.mxu1 %vm1314_vm1, %v1315_v4 }
 0x56f   :  { %v496_v19 = vpop.xlane.xlu1 %495 }
 0x570   :  { %v493_v20 = vpop.xlane.xlu0 %492 }
 0x5bc   :  { %v572_v8 = vpop.f32.mrb[2].mxu1 }
 0x5bd   :  { %v579_v15 = vrot.slane %v572_v8, %v271_v18  ;;  %v1088_v17 = vpop.f32.mrb[3].mxu1 }
 0x5bf   :  { %v580_v21 = vadd.f32 %v579_v15, %v493_v20  ;;  %v581_v22 = vadd.f32 %v579_v15, %v496_v19 }
 0x5c1   :  { %v584_v23 = vmul.f32 0.2, %v580_v21  ;;  %v585_v24 = vmul.f32 0.2, %v581_v22  ;;  %vm583_vm9 = vcmp.gt.f32.partialorder %v581_v22, 0.0  ;;  %vm582_vm10 = vcmp.gt.f32.partialorder %v580_v21, 0.0 }
 0x5c3   :  { %v587_v25 = vsel %vm583_vm9, %v581_v22, %v585_v24  ;;  %v586_v26 = vsel %vm582_vm10, %v580_v21, %v584_v23 }
 0x5c4   :  { %v589_v27 = vadd.f32 %v587_v25, %v1473_v32  ;;  %v588_v29 = vadd.f32 %v586_v26, %v1471_v28 }
 0x5c6   :  { %v593_v30 = vsel %vm283_vm8, %v589_v27, -inf  ;;  %v590_v16 = vsel %vm283_vm8, %v588_v29, -inf }
 0x5c7   :  { %594 = vmax.xlane.f32.xlu1 %v593_v30  ;;  %591 = vmax.xlane.f32.xlu0 %v590_v16 }
 0x654   :  { %v595_v18 = vpop.xlane.xlu1 %594  ;;  %v592_v31 = vpop.xlane.xlu0 %591 }
 0x655   :  { %v597_v33 = vsub.f32 %v589_v27, %v595_v18  ;;  %v596_v34 = vsub.f32 %v588_v29, %v592_v31 }
 0x657   :  { %v600_v35 = vmul.f32 1.442695, %v597_v33  ;;  %v598_v36 = vmul.f32 1.442695, %v596_v34 }
 0x659   :  { %1183 = vpow2.f32 %v600_v35 }
 0x65a   :  { %1185 = vpow2.f32 %v598_v36 }
 0x663   :  { %v1184_v37 = vpop.eup %1183 }
 0x664   :  { %v1186_v38 = vpop.eup %1185  ;;  %v605_v32 = vsel %vm283_vm8, %v1184_v37, 0.0 }
 0x665   :  { %606 = vadd.xlane.f32.xlu1 %v605_v32  ;;  %v602_v28 = vsel %vm283_vm8, %v1186_v38, 0.0 }
 0x666   :  { %603 = vadd.xlane.f32.xlu0 %v602_v28 }
 0x6f2   :  { %v607_v39 = vpop.xlane.xlu1 %606 }
 0x6f3   :  { %1187 = vrcp.f32 %v607_v39  ;;  %v604_v40 = vpop.xlane.xlu0 %603 }
 0x6f4   :  { %1189 = vrcp.f32 %v604_v40 }
 0x6fd   :  { %v1188_v41 = vpop.eup %1187 }
 0x6fe   :  { %v1190_v42 = vpop.eup %1189  ;;  %v611_v43 = vmul.f32 %v1188_v41, %v1184_v37 }
 0x6ff   :  { %v610_v44 = vmul.f32 %v1190_v42, %v1186_v38 }
 0x701   :  { %1093 = vmatprep.mubr.msk.f32.mxu0 %vm283_vm8, %v610_v44 }
 0x702   :  { %1094 = vmatmul.mubr.msk.f32.vlgmr.msra.gmra.mrb[6].mxu0 %vm283_vm8, %v611_v43 }
 0x703   :  { %1111 = vmatprep.mubr.msk.f32.mxu0 %vm1314_vm1, %v1315_v4  ;;  %1154 = vmatpush3.bf16.msra.mxu0 %v1153_v48 }
 0x704   :  { %1155 = vmatprep.subr.bf16.mxu0 %v1313_v3 }
 0x707   :  { %1157 = vmatpush3.bf16.msra.mxu0 %v1156_v50 }
 0x7d5   :  { %v1095_v52 = vpop.f32.mrb[6].mxu0 }
 0x7d6   :  { %v696_v53 = vadd.f32 %v1095_v52, %v1008_v51  ;;  %v690_v54 = vpop.f32.mrb[7].mxu0 }
 0x7d7   :  { %v691_v55 = vadd.f32 %v1008_v51, %v690_v54 }
 0x7d8   :  { %943 = vst.msk [vmem:[#allocation7 + $0x8] sm:$0xff] %vm183_vm2, %v696_v53 }
 0x7d9   :  { %v1150_v56 = vpack.c.bf16 %v696_v53, %v691_v55  ;;  %942 = vst.msk [vmem:[#allocation7] sm:$0xff] %vm183_vm2, %v691_v55 }
 0x7db   :  { %1151 = vmatpush3.bf16.msra.mxu1 %v1150_v56 }
 0x7dc   :  { %1158 = vmatprep.subr.bf16.mxu1 %v1313_v3 }
 0x7de   :  { %1101 = vmatmul.mubr.msk.f32.vlgmr.msra.gmra.mrb[4].mxu1 %vm283_vm8, %v699_v57 }
 0x7df   :  { %1122 = vmatprep.mubr.msk.f32.mxu1 %vm1314_vm1, %v1315_v4  ;;  %1160 = vmatpush3.bf16.msra.mxu1 %v1159_v60  ;;  %v860_v4 = vld [vmem:[%s1625_s13 + $0x10] sm:$0xff] }
 0x7e0   :  { %1161 = vmatprep.subr.bf16.mxu1 %v1313_v3  ;;  %v1162_v0 = vpack.c.bf16 %v861_v63, %v860_v4  ;;  %v1012_v3 = vld [vmem:[%s1624_s12] ss:$0 sm:$0xff] }
 0x7e3   :  { %1163 = vmatpush3.bf16.msra.mxu1 %v1162_v0 }
 0x8b1   :  { %v769_v61 = vpop.f32.mrb[4].mxu1 }
 0x8b2   :  { %v1102_v62 = vpop.f32.mrb[5].mxu1  ;;  %1112 = vmatmul.mubr.msk.f32.vlgmr.msra.gmra.mrb[8].mxu0 %vm183_vm2, %v769_v61  ;;  %945 = vst.msk [vmem:[#allocation8] sm:$0x3] %vm944_vm11, %v769_v61 }
 0x985   :  { %v853_v1 = vpop.f32.mrb[8].mxu0 }
 0x986   :  { %v854_v2 = vadd.f32 %v1012_v3, %v853_v1  ;;  %v1113_v5 = vpop.f32.mrb[9].mxu0 }
 0x988   :  { %v857_v6 = vmax.f32 %v854_v2, 0.0 }
 0x98a   :  { %1123 = vmatmul.mubr.msk.f32.vlgmr.msra.gmra.mrb[6].mxu1 %vm183_vm2, %v857_v6 }
 0x98b   :  { %1246 = shalt.err (!%p1243_p6)
}
 0x98c   :  { %s1247_s3 = scalar_lea.hbm %s1628_s16, 32 }
 0x98d   :  { %p1248_p7 = scmp.ne.s32.totalorder %s1628_s16, %s1247_s3  ;;  %p1251_p8 = scmp.lt.u32.totalorder %s1247_s3, %s1628_s16 }
 0x98f   :  { %p1253_p9 = pnand %p1251_p8, %p1248_p7 }
 0x991   :  { %1256 = shalt.err (!%p1253_p9)
}
 0x992   :  { %969 = dma.vmem_to_hbm [thread:$0]  %s967_s7, 32, %s1628_s16, [#allocation9]  }
 0x993   :  { %s1257_s11 = scalar_lea.vmem %s954_s9, 256  ;;  %p1262_p11 = scmp.lt.s32.totalorder %s954_s9, %s954_s9 }
 0x994   :  { %p1258_p10 = scmp.ne.s32.totalorder %s954_s9, %s1257_s11  ;;  %p1263_p12 = scmp.lt.s32.totalorder %s1257_s11, %s1257_s11 }
 0x996   :  { %p1264_p13 = por %p1263_p12, %p1262_p11 }
 0x998   :  { %p1265_p0 = pnand %p1264_p13, %p1258_p10 }
 0x99a   :  { %1268 = shalt.err (!%p1265_p0)
}
 0x99b   :  { %s1269_s19 = scalar_lea.hbm %s1627_s15, 256 }
 0x99c   :  { %p1270_p1 = scmp.ne.s32.totalorder %s1627_s15, %s1269_s19  ;;  %p1273_p2 = scmp.lt.u32.totalorder %s1269_s19, %s1627_s15 }
 0x99e   :  { %p1275_p3 = pnand %p1273_p2, %p1270_p1 }
 0x9a0   :  { %1278 = shalt.err (!%p1275_p3)
}
 0x9a1   :  { %959 = dma.vmem_to_hbm [thread:$0]  %s954_s9, 256, %s1627_s15, [#allocation4], %s1310_s20, %s1310_s20, %s1311_s21   ;;  %vm946_vm12 = vcmask 25600  }
 0x9a2   :  { %v1014_v7 = vld [vmem:[%s1626_s14] ss:$0 sm:$0xff]  ;;  %s1319_s27 = smov [#allocation10]  }
 0x9a3   :  { %s976_s6 = sshll.u32 %s1319_s27, 4  ;;  %s977_s6 = int_to_ptr.vmem [resolvable:$true] %s976_s6 }
 0x9a4   :  { %s1279_s7 = scalar_lea.vmem %s977_s6, 32  ;;  %p1284_p5 = scmp.lt.s32.totalorder %s977_s6, %s977_s6 }
 0x9a5   :  { %p1280_p4 = scmp.ne.s32.totalorder %s977_s6, %s1279_s7  ;;  %p1285_p6 = scmp.lt.s32.totalorder %s1279_s7, %s1279_s7 }
 0x9a7   :  { %p1286_p7 = por %p1285_p6, %p1284_p5 }
 0x9a9   :  { %p1287_p8 = pnand %p1286_p7, %p1280_p4 }
 0xa5d   :  { %v938_v9 = vpop.f32.mrb[6].mxu1 }
 0xa5e   :  { %v939_v10 = vadd.f32 %v1014_v7, %v938_v9  ;;  %v1124_v11 = vpop.f32.mrb[7].mxu1 }
 0xa60   :  { %947 = vst.msk [vmem:[#allocation10] sm:$0x3] %vm946_vm12, %v939_v10 }
 0xa61   :  { %1290 = shalt.err (!%p1287_p8)
}
 0xa62   :  { %s1640_s21 = sld [smem:[#allocation17_spill]] }
 0xa68   :  { %s1291_s8 = scalar_lea.hbm %s1640_s21, 32 }
 0xa69   :  { %p1292_p9 = scmp.ne.s32.totalorder %s1640_s21, %s1291_s8  ;;  %p1295_p10 = scmp.lt.u32.totalorder %s1291_s8, %s1640_s21 }
 0xa6b   :  { %p1297_p11 = pnand %p1295_p10, %p1292_p9 }
 0xa6d   :  { %1300 = shalt.err (!%p1297_p11)
}
 0xa6e   :  { %979 = dma.vmem_to_hbm [thread:$0]  %s977_s6, 32, %s1640_s21, [#allocation9]  }
 0xa6f   :  { %1305 = dma.done.wait [#allocation4], 256  }
 0xa70   :  { %1306 = vsyncadd [#allocation4], 4294967040 }
 0xa71   :  { %1307 = dma.done.wait [#allocation9], 64  }
 0xa72   :  { %1308 = vsyncadd [#allocation9], 4294967232 }
 0xa73   :  { %989 = vsyncpa [#allocation3], 1 }
 0xa74   :  { %990 = vsyncpa [#allocation6], 1 }
 0xa75   :  { %991 = vsyncpa [#allocation4], 1 }
 0xa76   :  { %992 = vsyncpa [#allocation9], 1 }

</bundles_post_ra>
